<compile_context>
chip_gen: v5e
topology: v5e:2x2
jax: 0.10.0
libtpu: 0.0.40
codegen_flags: <defaults>
</compile_context>

<pallas_src>
import functools

import jax
import jax.numpy as jnp
from jax.experimental import pallas as pl
from jax.experimental.pallas import tpu as pltpu

NX = 2        # state dim
NU = 1        # action dim
HIDDEN = 50   # hidden_neurons (default in the PyTorch module)
_SLAB = 8     # padded K of layer 1 (one sublane group): [x0, x1, u, 1, 0*4]
_SPLIT_THRESHOLD = 16384  # force >=2 grid tiles above this (v7x megacore parity)


def _mlp_kernel(xu_ref, w1p_ref, w2_ref, b2_ref, out_ref, *, act_dtype):
    """out^T = W2 @ tanh(W1p @ xu^T) + b2 for one batch tile (all on MXU/EUP)."""
    # Layer 1 on the MXU: (H, 8) @ (8, TB); b1 is folded in via the ones row.
    pre = jnp.dot(w1p_ref[...], xu_ref[...],
                  preferred_element_type=jnp.float32)       # (HIDDEN, TB)
    # tanh on the EUP.  act_dtype=bfloat16 doubles EUP/VPU rate on v6e/v7x but
    # will NOT meet a 1e-5 tolerance; default is float32 (exact).
    h = jnp.tanh(pre.astype(act_dtype))                      # (HIDDEN, TB)
    # Layer 2 on the MXU: (NX, HIDDEN) @ (HIDDEN, TB) -> lane-dense (NX, TB).
    o = jnp.dot(w2_ref[...].astype(act_dtype), h,
                preferred_element_type=jnp.float32)          # (NX, TB)
    out_ref[...] = (o + b2_ref[...]).astype(out_ref.dtype)   # single VPU add


def _choose_tile(batch, block_b):
    """Pick a lane tile: multiple of 128, >=2 tiles for big batches (v7x)."""
    if batch <= 128:
        return batch                       # single full-extent block
    tb = min(block_b, batch)
    if batch >= _SPLIT_THRESHOLD:
        tb = min(tb, -(-batch // 2))       # ensure >=2 grid steps (megacore)
    if tb < batch:
        tb = max(128, (tb // 128) * 128)   # lane-dense, unmasked stores
    return tb


def pack_inputs(x, u):
    """[B, NX], [B, NU] -> packed xu^T [8, B] = rows [x0, x1, u, 1, 0...]."""
    batch = x.shape[0]
    ones = jnp.ones((1, batch), jnp.float32)
    zeros = jnp.zeros((_SLAB - NX - NU - 1, batch), jnp.float32)
    return jnp.concatenate(
        [x.astype(jnp.float32).T, u.astype(jnp.float32).T, ones, zeros], axis=0)


def pack_w1(w1, b1):
    """Torch-layout W1 [H, NX+NU], b1 [H] -> W1p [H, 8] = [W1 | b1 | 0...]."""
    hidden = w1.shape[0]
    pad = jnp.zeros((hidden, _SLAB - w1.shape[1] - 1), jnp.float32)
    return jnp.concatenate(
        [w1.astype(jnp.float32), b1.reshape(hidden, 1).astype(jnp.float32), pad],
        axis=1)


def neural_msd_forward_packed(xu_packed, w1p, w2, b2, *,
                              block_b=32768, act_dtype=jnp.float32):
    """Packed-layout forward: xu^T [8, B] -> out^T [NX, B]  (zero-copy entry)."""
    slab, batch = xu_packed.shape
    assert slab == _SLAB
    hidden = w1p.shape[0]
    b2c = b2.reshape(NX, 1).astype(jnp.float32)
    w2c = w2.astype(jnp.float32)

    tb = _choose_tile(batch, block_b)
    grid = (pl.cdiv(batch, tb),)

    data_spec = lambda rows: pl.BlockSpec((rows, tb), lambda i: (0, i))
    resident = lambda shape: pl.BlockSpec(shape, lambda i: (0, 0))

    cost = pl.CostEstimate(
        flops=int(batch) * (2 * _SLAB * hidden + 2 * hidden * NX + NX),
        transcendentals=int(batch) * hidden,
        bytes_accessed=int(batch) * 4 * (_SLAB + NX)
        + int(4 * (w1p.size + w2c.size + b2c.size)),
    )

    kernel = functools.partial(_mlp_kernel, act_dtype=act_dtype)
    return pl.pallas_call(
        kernel,
        out_shape=jax.ShapeDtypeStruct((NX, batch), jnp.float32),
        grid=grid,
        in_specs=[
            data_spec(_SLAB),            # packed xu^T, one dense DMA per tile
            resident(w1p.shape),         # weights stay VMEM-resident
            resident(w2c.shape),
            resident(b2c.shape),
        ],
        out_specs=data_spec(NX),
        compiler_params=pltpu.CompilerParams(
            dimension_semantics=("parallel",),   # shard tiles across v7x TCs
            vmem_limit_bytes=48 * 1024 * 1024,   # < 64 MiB (v7x physical VMEM)
        ),
        cost_estimate=cost,
    )(xu_packed, w1p, w2c, b2c)


def neural_msd_forward(x, u, w1, b1, w2, b2, *,
                       block_b=32768, act_dtype=jnp.float32):
    """Torch-signature forward: x [B, NX], u [B, NU] -> [B, NX]."""
    # TODO(synk): the pack + final transpose are extra XLA HBM passes; callers
    # that can keep the batch-on-lanes packed layout end-to-end should call
    # neural_msd_forward_packed directly (and pre-pack W1 once with pack_w1).
    xu_packed = pack_inputs(x, u)
    w1p = pack_w1(w1, b1)
    outT = neural_msd_forward_packed(xu_packed, w1p, w2, b2,
                                     block_b=block_b, act_dtype=act_dtype)
    return outT.T


def init_params(key, hidden=HIDDEN):
    """PyTorch-style init, torch weight layout: U(-1/sqrt(fan_in), 1/sqrt(fan_in))."""
    k1, k2, k3, k4 = jax.random.split(key, 4)
    fan1 = NX + NU
    bound1 = 1.0 / jnp.sqrt(jnp.float32(fan1))
    bound2 = 1.0 / jnp.sqrt(jnp.float32(hidden))
    w1 = jax.random.uniform(k1, (hidden, fan1), jnp.float32, -bound1, bound1)
    b1 = jax.random.uniform(k2, (hidden,), jnp.float32, -bound1, bound1)
    w2 = jax.random.uniform(k3, (NX, hidden), jnp.float32, -bound2, bound2)
    b2 = jax.random.uniform(k4, (NX,), jnp.float32, -bound2, bound2)
    return w1, b1, w2, b2


if __name__ == "__main__":
    key = jax.random.PRNGKey(0)
    kx, ku, kp = jax.random.split(key, 3)
    w1, b1, w2, b2 = init_params(kp)

    def reference(x, u):
        xu = jnp.concatenate([x, u], axis=-1)
        return jnp.tanh(xu @ w1.T + b1) @ w2.T + b2

    # Multi-tile case: 256 rows, 2 grid steps of 128 lanes each.
    batch = 256
    x = jax.random.normal(kx, (batch, NX), jnp.float32)
    u = jax.random.normal(ku, (batch, NU), jnp.float32)
    out = neural_msd_forward(x, u, w1, b1, w2, b2, block_b=128)
    jax.block_until_ready(out)
    assert out.shape == (batch, NX)
    assert jnp.allclose(out, reference(x, u), atol=1e-5, rtol=1e-5)

    # Ragged final tile: 200 rows with 128-lane tiles (padded columns masked).
    xr, ur = x[:200], u[:200]
    outr = neural_msd_forward(xr, ur, w1, b1, w2, b2, block_b=128)
    jax.block_until_ready(outr)
    assert outr.shape == (200, NX)
    assert jnp.allclose(outr, reference(xr, ur), atol=1e-5, rtol=1e-5)

    # Tiny single-block case (block == full extent), default tile selection.
    xs, us = x[:8], u[:8]
    outs = neural_msd_forward(xs, us, w1, b1, w2, b2)
    jax.block_until_ready(outs)
    assert outs.shape == (8, NX)
    assert jnp.allclose(outs, reference(xs, us), atol=1e-5, rtol=1e-5)

    print("KERNEL_OK")
</pallas_src>

<mosaic_0001>
module attributes {stable_mosaic.version = 11 : i64} {
  func.func @_mlp_kernel(%arg0: i32, %arg1: memref<8x128xf32, #tpu.memory_space<vmem>>, %arg2: memref<50x8xf32, #tpu.memory_space<vmem>>, %arg3: memref<2x50xf32, #tpu.memory_space<vmem>>, %arg4: memref<2x1xf32, #tpu.memory_space<vmem>>, %arg5: memref<2x128xf32, #tpu.memory_space<vmem>>) attributes {dimension_semantics = [#tpu.dimension_semantics<parallel>], iteration_bounds = array<i64: 2>, scalar_prefetch = 0 : i64, scratch_operands = 0 : i64, tpu.core_type = #tpu.core_type<tc>, window_params = [{transform_indices = @transform_0, window_bounds = array<i64: 8, 128>}, {pipeline_mode = #tpu.pipeline_mode<synchronous>, transform_indices = @transform_1, window_bounds = array<i64: 50, 8>}, {pipeline_mode = #tpu.pipeline_mode<synchronous>, transform_indices = @transform_2, window_bounds = array<i64: 2, 50>}, {pipeline_mode = #tpu.pipeline_mode<synchronous>, transform_indices = @transform_3, window_bounds = array<i64: 2, 1>}, {transform_indices = @transform_4, window_bounds = array<i64: 2, 128>}]} {
    %c0 = arith.constant 0 : index
    %c0_0 = arith.constant 0 : index
    %0 = vector.load %arg2[%c0, %c0_0] : memref<50x8xf32, #tpu.memory_space<vmem>>, vector<50x8xf32>
    %c0_1 = arith.constant 0 : index
    %c0_2 = arith.constant 0 : index
    %1 = vector.load %arg1[%c0_1, %c0_2] : memref<8x128xf32, #tpu.memory_space<vmem>>, vector<8x128xf32>
    %cst = arith.constant dense<0.000000e+00> : vector<50x128xf32>
    %2 = tpu.matmul %0, %1, %cst {dimension_numbers = #tpu.dot_dimension_numbers<[1], [0], [0], [1], [0, 0, 1, 1], [], []>} : vector<50x8xf32>, vector<8x128xf32>, vector<50x128xf32> -> vector<50x128xf32>
    %3 = math.tanh %2 : vector<50x128xf32>
    %c0_3 = arith.constant 0 : index
    %c0_4 = arith.constant 0 : index
    %4 = vector.load %arg3[%c0_3, %c0_4] : memref<2x50xf32, #tpu.memory_space<vmem>>, vector<2x50xf32>
    %cst_5 = arith.constant dense<0.000000e+00> : vector<2x128xf32>
    %5 = tpu.matmul %4, %3, %cst_5 {dimension_numbers = #tpu.dot_dimension_numbers<[1], [0], [0], [1], [0, 0, 1, 1], [], []>} : vector<2x50xf32>, vector<50x128xf32>, vector<2x128xf32> -> vector<2x128xf32>
    %c0_6 = arith.constant 0 : index
    %c0_7 = arith.constant 0 : index
    %6 = vector.load %arg4[%c0_6, %c0_7] : memref<2x1xf32, #tpu.memory_space<vmem>>, vector<2x1xf32>
    %7 = vector.broadcast %6 : vector<2x1xf32> to vector<2x128xf32>
    %8 = arith.addf %5, %7 : vector<2x128xf32>
    %c0_8 = arith.constant 0 : index
    %c0_9 = arith.constant 0 : index
    %9 = vector.load %arg5[%c0_8, %c0_9] : memref<2x128xf32, #tpu.memory_space<vmem>>, vector<2x128xf32>
    tpu.vector_store %arg5[%c0_8, %c0_9], %8 {strides = array<i32>} : memref<2x128xf32, #tpu.memory_space<vmem>>, vector<2x128xf32>,
    return
  }
  func.func @transform_0(%arg0: i32) -> (i32, i32) {
    %c0_i32 = arith.constant 0 : i32
    %c0_i32_0 = arith.constant 0 : i32
    return %c0_i32, %arg0 : i32, i32
  }
  func.func @transform_1(%arg0: i32) -> (i32, i32) {
    %c0_i32 = arith.constant 0 : i32
    %c0_i32_0 = arith.constant 0 : i32
    %c0_i32_1 = arith.constant 0 : i32
    return %c0_i32, %c0_i32_0 : i32, i32
  }
  func.func @transform_2(%arg0: i32) -> (i32, i32) {
    %c0_i32 = arith.constant 0 : i32
    %c0_i32_0 = arith.constant 0 : i32
    %c0_i32_1 = arith.constant 0 : i32
    return %c0_i32, %c0_i32_0 : i32, i32
  }
  func.func @transform_3(%arg0: i32) -> (i32, i32) {
    %c0_i32 = arith.constant 0 : i32
    %c0_i32_0 = arith.constant 0 : i32
    %c0_i32_1 = arith.constant 0 : i32
    return %c0_i32, %c0_i32_0 : i32, i32
  }
  func.func @transform_4(%arg0: i32) -> (i32, i32) {
    %c0_i32 = arith.constant 0 : i32
    %c0_i32_0 = arith.constant 0 : i32
    return %c0_i32, %arg0 : i32, i32
  }
}

</mosaic_0001>

<bundles_post_ra>
// kernel: tpu_custom_call.1
= control target key start
LH: loop header
LB: loop body
LE: loop exit
PB: predicated region body
PF: predicated region fallthrough
CT: control target
= control target key end

     0   :  { %9 = vsyncpa [#allocation3], 0  ;;  %s664_s0 = inlined_call_operand.vmem [shape: f32[8,256], index: 0, kind: input, shape index: {}]   ;;  %s665_s1 = inlined_call_operand.vmem [shape: f32[50,8], index: 1, kind: input, shape index: {}]   ;;  %s666_s2 = inlined_call_operand.vmem [shape: f32[2,50], index: 2, kind: input, shape index: {}]   ;;  %s667_s3 = inlined_call_operand.vmem [shape: f32[2,1], index: 3, kind: input, shape index: {}]   ;;  %s668_s4 = inlined_call_operand.hbm [shape: f32[2,256], index: 4, kind: output, shape index: {}]  }
   0x1   :  { %11 = vsyncpa [#allocation3 + $0x1], 0  ;;  %s545_s15 = smov 0   ;;  %s547_s16 = smov 0  }
   0x2   :  { %s549_s17 = smov 0   ;;  %s551_s18 = smov 0  }
   0x3 LB: > { %s566_s19 = sadd.s32 4294967295, %s517_s18   ;;  %s379_s20 = sadd.s32 4294967294, %s517_s18   ;;  %s517_s18 = sphi %s551_s18, %s674_s18   ;;  %s513_s17 = sphi %s549_s17, %s673_s17   ;;  %s509_s16 = sphi %s547_s16, %s672_s16   ;;  %s505_s15 = sphi %s545_s15, %s671_s15  }
   0x4   : > { %s570_s21 = sadd.s32 1, %s517_s18   ;;  %s113_s22 = sadd.s32 1, %s513_s17 }
   0x5   : > { %s110_s23 = ssub.s32 %s517_s18, %s570_s21  ;;  %p123_p0 = scmp.ne.s32.totalorder %s513_s17, %s509_s16 }
   0x6   : > { %p111_p1 = scmp.eq.s32.totalorder %s110_s23, 0  ;;  %p124_p2 = scmp.eq.s32.totalorder %s566_s19, 1 }
   0x7   : > { %p129_p3 = scmp.ne.s32.totalorder %s509_s16, %s505_s15  ;;  %p130_p4 = scmp.eq.s32.totalorder %s379_s20, 1 }
   0x8   : > { %s581_s24 = scalar_select %p111_p1, %s513_s17, %s113_s22  }
   0x9   : > { %p583_p5 = por %p124_p2, %p123_p0  ;;  %p587_p6 = por %p130_p4, %p129_p3 }
   0xa   : > { %p382_p7 = scmp.ge.s32.totalorder %s517_s18, 1  ;;  %p164_p8 = scmp.lt.s32.totalorder %s517_s18, 3 }
   0xc   : > { %p165_p9 = pnand %p382_p7, %p164_p8 }
   0xd   : > { %p189_p10 = scmp.lt.s32.totalorder (!%p165_p9), %s566_s19, 1  ;;  %s186_s7 = sand.u32 (!%p165_p9), 1, %s509_s16  }
   0xe   : > { %168 = sbr.rel (%p165_p9) target bundleno = 324 (0x144), region = 36  ;;  %s383_s8 = sshll.u32 (!%p165_p9), %s186_s7, 1 }
   0xf   : > { %s395_s9 = sshll.u32 (!%p165_p9), %s566_s19, 1  ;;  %s188_s13 = scalar_lea.vmem (!%p165_p9), [#allocation2], %s383_s8 }
  0x10   : > { %s315_s12 = scalar_lea.hbm (!%p165_p9), %s668_s4, %s395_s9  ;;  %s317_s14 = sshll.u32 (!%p165_p9), %s188_s13, 4  ;;  %s318_s14 = int_to_ptr.vmem [resolvable:$true] %s317_s14 }
  0x11   : > { %s319_s20 = sshll.u32 (!%p165_p9), %s315_s12, 4  ;;  %s305_s22 = scalar_lea.sflag (!%p165_p9), [#allocation3], %s186_s7  ;;  %s320_s20 = int_to_ptr.hbm [resolvable:$true] %s319_s20 }
  0x12   : > { %s469_s23 = sshra.s32 (!%p165_p9), %s320_s20, 4  ;;  %s475_s29 = scalar_lea.hbm (!%p165_p9), %s668_s4, 4  ;;  %s470_s23 = int_to_ptr.hbm [resolvable:$true] %s469_s23 }
  0x13   : > { %s190_s27 = scalar_select %p189_p10, %s566_s19, 1  ;;  %v197_v0 = vld [vmem:[%s665_s1 + $0x20] sm:$0xff]  ;;  %vm201_vm0 = vcmask 64512   ;;  %v196_v3 = vld [vmem:[%s665_s1 + $0x18] sm:$0xff]  ;;  %v198_v4 = vld [vmem:[%s665_s1 + $0x28] sm:$0xff]  ;;  %v519_v11 = vmov 0  }
  0x14   : > { %v193_v1 = vld [vmem:[%s665_s1] sm:$0xff]  ;;  %v194_v5 = vld [vmem:[%s665_s1 + $0x8] sm:$0xff]  ;;  %v199_v6 = vld [vmem:[%s665_s1 + $0x30] sm:$0x3]  ;;  %440 = vset.pattern.permute.xlu0 %v519_v11  ;;  %vm279_vm1 = vcmask 1041408   ;;  %vm275_vm2 = vcmask 408576   ;;  %p476_p0 = scmp.lt.s32.totalorder %s470_s23, %s668_s4 }
  0x15   : > { %s384_s28 = sshll.u32 %s190_s27, 3  ;;  %v195_v7 = vld [vmem:[%s665_s1 + $0x10] sm:$0xff]  ;;  %v269_v10 = vld [vmem:[%s667_s3] sm:$0x3]  ;;  %s471_s27 = scalar_lea.hbm %s470_s23, 2 }
  0x16   : > { %s192_s5 = scalar_lea.vmem %s664_s0, %s384_s28  ;;  %272 = vperm.xlu0 %440, %v269_v10   ;;  %v268_v23 = vld [vmem:[%s666_s2] sm:$0x3]  ;;  %p472_p11 = scmp.ne.s32.totalorder %s470_s23, %s471_s27 }
  0x17   : > { %v200_v2 = vld [vmem:[%s192_s5] sm:$0xff]  ;;  %p477_p1 = scmp.lt.s32.totalorder %s475_s29, %s471_s27 }
  0x18   : > { %399 = vmatpush.msra.mxu3 %v200_v2  ;;  %238 = vmatpush.msra.mxu0 %v200_v2  ;;  %p473_p12 = pnand %p472_p11, %p583_p5 }
  0x19   : > { %389 = vmatmul.msk.f32.vlgmr.msra.gmra.mxu3 %vm201_vm0, %v197_v0  ;;  %385 = vmatmul.msk.f32.vlgmr.msra.gmra.mxu0 %vm201_vm0, %v193_v1  ;;  %p478_p2 = por %p477_p1, %p476_p0 }
  0x1a   : > { %398 = vmatpush.msra.mxu2 %v200_v2  ;;  %p474_p13 = pneg %p473_p12 }
  0x1b   : > { %388 = vmatmul.msk.f32.vlgmr.msra.gmra.mxu2 %vm201_vm0, %v196_v3 }
  0x1c   : > { %p479_p3 = pnand %p478_p2, %p474_p13 }
  0x21   : > { %390 = vmatmul.msk.f32.gmra.mxu3 %vm201_vm0, %v198_v4  ;;  %386 = vmatmul.msk.f32.gmra.mxu0 %vm201_vm0, %v194_v5 }
  0x29   : > { %391 = vmatmul.msk.f32.gmra.mxu3 %vm201_vm0, %v199_v6  ;;  %387 = vmatmul.msk.f32.gmra.mxu0 %vm201_vm0, %v195_v7 }
  0x88   : > { %v273_v25 = vpop.permute.xlu0 %272 }
  0x96   : > { %v240_v9 = vpop.f32.mrf.mxu0 }
  0x9c   : > { %v252_v8 = vpop.f32.mrf.mxu3 }
  0x9e   : > { %v243_v13 = vpop.f32.mrf.mxu0  ;;  %v249_v15 = vpop.f32.mrf.mxu2 }
  0xa4   : > { %v255_v12 = vpop.f32.mrf.mxu3 }
  0xa6   : > { %v246_v16 = vpop.f32.mrf.mxu0 }
  0xac   : > { %v258_v14 = vpop.f32.mrf.mxu3 }
  0xad   : > { %441 = vtanh.f32 %v258_v14 }
  0xae   : > { %443 = vtanh.f32 %v255_v12 }
  0xaf   : > { %445 = vtanh.f32 %v252_v8 }
  0xb0   : > { %447 = vtanh.f32 %v249_v15 }
  0xb1   : > { %449 = vtanh.f32 %v246_v16 }
  0xb2   : > { %451 = vtanh.f32 %v243_v13 }
  0xb3   : > { %v442_v17 = vpop.eup %441  ;;  %453 = vtanh.f32 %v240_v9 }
  0xb4   : > { %392 = vmatpush.msk.msra.mxu1 %vm279_vm1, %v442_v17  ;;  %v444_v18 = vpop.eup %443 }
  0xb5   : > { %v446_v19 = vpop.eup %445 }
  0xb6   : > { %293 = vmatpush.msra.mxu1 %v444_v18  ;;  %v448_v20 = vpop.eup %447 }
  0xb7   : > { %v450_v21 = vpop.eup %449 }
  0xb8   : > { %294 = vmatpush.msra.mxu1 %v446_v19  ;;  %v452_v22 = vpop.eup %451 }
  0xb9   : > { %v454_v24 = vpop.eup %453 }
  0xba   : > { %295 = vmatpush.msra.mxu1 %v448_v20 }
  0xbc   : > { %296 = vmatpush.msra.mxu1 %v450_v21 }
  0xbe   : > { %297 = vmatpush.msra.mxu1 %v452_v22 }
  0xc0   : > { %298 = vmatpush.msra.mxu1 %v454_v24 }
  0xc1   : > { %393 = vmatmul.msk.f32.vlgmr.msra.gmra.mxu1 %vm275_vm2, %v268_v23 }
 0x13e   : > { %v300_v26 = vpop.f32.mrf.mxu1 }
 0x13f   : > { %v301_v27 = vadd.f32 %v300_v26, %v273_v25 }
 0x141   : > { %303 = vst [vmem:[%s188_s13] sm:$0x3] %v301_v27 }
 0x142   : > { %482 = shalt.err (!%p479_p3)
}
 0x143   : > { %400 = dma.vmem_to_hbm [thread:$0]  (%p583_p5), %s318_s14, 32, %s320_s20, %s305_s22  }
 0x144 PF: > { %p406_p4 = scmp.ge.s32.totalorder %s517_s18, 2  ;;  %s331_s6 = sand.u32 1, %s505_s15  }
 0x145   : > { %s332_s7 = scalar_lea.sflag [#allocation3], %s331_s6 }
 0x146   : > { %p403_p7 = pnand %p406_p4, %p587_p6 }
 0x148   : > { %p404_p8 = pneg %p403_p7 }
 0x14a   : > { %500 = dma.done.wait (%p404_p8), %s332_s7, 32  }
 0x14b   : > { %502 = vsyncadd (%p404_p8), %s332_s7, 4294967264  ;;  %p14_p9 = scmp.ge.s32.totalorder %s570_s21, 4   ;;  %s671_s15 = smov %s509_s16 }
 0x14c   : > { %s672_s16 = smov %s513_s17  ;;  %s673_s17 = smov %s581_s24 }
 0x14d   : > { %s674_s18 = smov %s570_s21  ;;  %16 = sbr.rel (!%p14_p9) target bundleno = 3 (0x3), region = 71 }
 0x152   :  { %338 = vsyncpa [#allocation3], 1 }
 0x153   :  { %340 = vsyncpa [#allocation3 + $0x1], 1 }

</bundles_post_ra>
